<compile_context>
chip_gen: v6e
topology: v6e:2x2x1
jax: 0.10.0
libtpu: 0.0.40
codegen_flags: <defaults>
</compile_context>

<pallas_src>
from functools import partial

import jax
import jax.numpy as jnp
from jax.experimental import pallas as pl
from jax.experimental.pallas import tpu as pltpu


def _attention_encoder_kernel(ids_ref, table_ref, m_ref, out_ref, *, seq_len):
    # ids_ref:   (TB*L, 1) int32  — flattened token ids for this batch tile
    # table_ref: (V, E)    f32    — embedding table (resident, single-buffered)
    # m_ref:     (E, E)    f32    — attention matrix (resident, single-buffered)
    # out_ref:   (TB, E)   f32    — lane-dense output slab
    ids = ids_ref[...]                                    # (TB*L, 1) int32
    table = table_ref[...]                                # (V, E)
    m = m_ref[...]                                        # (E, E)
    rows = ids.shape[0]
    v_sz, e_sz = table.shape
    tb = rows // seq_len

    # --- fused embedding lookup: one-hot (TB*L, V) @ table (V, E) on the MXU.
    # TB*L is bounded (<= ~256) by _pick_tb, keeping the one-hot intermediate small.
    # TODO(synk): at realistic vocab sizes keep the table in HBM (memory_space=pl.ANY),
    # prefetch ids into SMEM (num_scalar_prefetch=1) and DMA row-gather only TB*L rows.
    # TODO(synk): a bf16 one-hot (exact 0/1) would cut MXU passes, but jnp.dot
    # re-promotes mixed operands; kept f32 so the gathered embeddings stay exact f32.
    vocab_iota = jax.lax.broadcasted_iota(jnp.int32, (rows, v_sz), 1)
    onehot = (vocab_iota == ids).astype(jnp.float32)      # (TB*L, V)
    x_flat = jnp.dot(onehot, table,
                     preferred_element_type=jnp.float32)  # (TB*L, E)
    x = x_flat.reshape(tb, seq_len, e_sz)                 # (TB, L, E)

    # --- mean word embedding per batch element
    x_avg = jnp.mean(x, axis=1)                           # (TB, E)

    # --- attention scores, algebraically collapsed:
    #     (x_wrd @ M) . x_avg  ==  x_wrd . (x_avg @ M^T)
    v = jnp.einsum("be,fe->bf", x_avg, m,
                   preferred_element_type=jnp.float32)    # (TB, E) = x_avg @ M^T
    # Keep scores 2-D with L on the lane axis (review): lane-axis reductions below.
    scores = jnp.sum(x * v[:, None, :], axis=-1)          # (TB, L)

    # --- softmax over the word axis L (dim=1 in the reference), exact divide
    s_max = jnp.max(scores, axis=-1, keepdims=True)       # (TB, 1)
    p = jnp.exp(scores - s_max)                           # (TB, L)
    denom = jnp.sum(p, axis=-1, keepdims=True)            # (TB, 1)
    a = p / denom                                         # (TB, L)

    # --- weighted average of word embeddings: z = a^T @ x_wrd
    z = jnp.sum(a[:, :, None] * x, axis=1)                # (TB, E)
    out_ref[...] = z.astype(out_ref.dtype)


def _is_v5():
    try:
        return "v5" in jax.devices()[0].device_kind.lower()
    except Exception:
        return False


def _pick_tb(batch, seq_len):
    """Batch-tile size.

    Goals (per review):
      * (tb, E) output block needs tb % 8 == 0 or tb == padded batch (sublane rule);
      * tb*L near the MXU width (128 on v5e, 256 on v6e/v7x) so the one-hot gather
        matmul fills the systolic array without a huge (tb*L, V) intermediate;
      * keep >= 2 grid steps when the batch allows (v7x has 2 TensorCores).
    """
    if batch <= 8:
        return batch                                      # single full-batch step
    b8 = -(-batch // 8) * 8                               # batch rounded up to mult of 8
    target_rows = 128 if _is_v5() else 256
    tb = max(8, min(b8, (target_rows // max(seq_len, 1)) // 8 * 8))
    if b8 >= 16:                                          # leave >= 2 grid steps
        tb = min(tb, max(8, (b8 // 2) // 8 * 8))
    return tb


def _resident_spec(shape):
    """BlockSpec for a parameter whose block is identical on every grid step."""
    index_map = lambda b: (0, 0)
    try:
        # Constant index_map => double-buffering is pure VMEM waste; single-buffer.
        return pl.BlockSpec(shape, index_map, pipeline_mode=pl.Buffered(1))
    except (TypeError, AttributeError):                   # older jax w/o pipeline_mode
        return pl.BlockSpec(shape, index_map)


def attention_encoder(inputs, emb_table, M, *, tb=None):
    """inputs: (B, L) int token ids, emb_table: (V, E) f32, M: (E, E) f32 -> (B, E)."""
    B, L = inputs.shape
    V, E = emb_table.shape
    assert M.shape == (E, E)
    if tb is None:
        tb = _pick_tb(B, L)

    # Pad the batch up to a multiple of tb (padded rows use token 0; sliced off below).
    B_pad = -(-B // tb) * tb
    assert tb == B_pad or tb % 8 == 0, (tb, B_pad)
    ids = inputs.astype(jnp.int32)
    if B_pad != B:
        ids = jnp.concatenate([ids, jnp.zeros((B_pad - B, L), jnp.int32)], axis=0)
    # Flatten ids in the wrapper (tiny int tensor): kernel gets a (TB*L, 1) block.
    ids_flat = ids.reshape(B_pad * L, 1)

    # Explicit scoped-VMEM budget: single-buffered table/M + double-buffered ids/out,
    # plus generous headroom for kernel intermediates / compiler scratch.
    footprint = (V * E + E * E) * 4 + 2 * (tb * L + tb * E) * 4
    vmem_limit = int(min(footprint + (16 << 20), 100 << 20))

    out = pl.pallas_call(
        partial(_attention_encoder_kernel, seq_len=L),
        out_shape=jax.ShapeDtypeStruct((B_pad, E), jnp.float32),
        grid_spec=pltpu.PrefetchScalarGridSpec(
            num_scalar_prefetch=0,
            grid=(B_pad // tb,),
            in_specs=[
                pl.BlockSpec((tb * L, 1), lambda b: (b, 0)),   # token ids
                _resident_spec((V, E)),                        # embedding table
                _resident_spec((E, E)),                        # attention matrix M
            ],
            out_specs=pl.BlockSpec((tb, E), lambda b: (b, 0)),  # lane-dense (TB, E)
        ),
        compiler_params=pltpu.CompilerParams(
            dimension_semantics=("parallel",),
            vmem_limit_bytes=vmem_limit),
    )(ids_flat, emb_table, M)
    return out[:B]                                         # (B, E)


def xavier_uniform(key, shape, dtype=jnp.float32):
    fan_in, fan_out = shape[0], shape[1]
    limit = (6.0 / (fan_in + fan_out)) ** 0.5
    return jax.random.uniform(key, shape, dtype, minval=-limit, maxval=limit)


def reference(inputs, emb_table, M):
    # pure-JAX reference of the PyTorch forward (including the embedding lookup)
    x_wrd = jnp.take(emb_table, inputs, axis=0)            # (B, L, E)
    x_avg = x_wrd.mean(axis=1)                             # (B, E)
    scores = jnp.einsum("ble,be->bl", x_wrd @ M, x_avg)    # (B, L)
    a = jax.nn.softmax(scores, axis=1)                     # (B, L)
    return jnp.einsum("bl,ble->be", a, x_wrd)              # (B, E)


if __name__ == "__main__":
    key = jax.random.PRNGKey(0)
    k_emb, k_m, k_idx = jax.random.split(key, 3)

    vocab_size, emb_size = 50, 32
    B, L = 2, 8

    # deterministic parameter init (synthetic; no checkpoint)
    emb_table = jax.random.normal(k_emb, (vocab_size, emb_size), jnp.float32)
    M = xavier_uniform(k_m, (emb_size, emb_size))
    # TODO(synk): bias parameter `b` exists in __init__ but is unused in forward; omitted.

    inputs = jax.random.randint(k_idx, (B, L), 0, vocab_size)   # token ids

    z = attention_encoder(inputs, emb_table, M)
    z = jax.block_until_ready(z)

    z_ref = reference(inputs, emb_table, M)
    assert z.shape == (B, emb_size)
    # exact softmax divide -> tight tolerance (only reassociation-level f32 noise)
    assert jnp.allclose(z, z_ref, atol=1e-4, rtol=1e-4), float(
        jnp.max(jnp.abs(z - z_ref)))
    print("KERNEL_OK")
</pallas_src>

<mosaic_0001>
module attributes {stable_mosaic.version = 11 : i64} {
  func.func @_attention_encoder_kernel(%arg0: i32, %arg1: memref<16x1xi32, #tpu.memory_space<vmem>>, %arg2: memref<50x32xf32, #tpu.memory_space<vmem>>, %arg3: memref<32x32xf32, #tpu.memory_space<vmem>>, %arg4: memref<2x32xf32, #tpu.memory_space<vmem>>) attributes {dimension_semantics = [#tpu.dimension_semantics<parallel>], iteration_bounds = array<i64: 1>, scalar_prefetch = 0 : i64, scratch_operands = 0 : i64, tpu.core_type = #tpu.core_type<tc>, window_params = [{transform_indices = @transform_0, window_bounds = array<i64: 16, 1>}, {pipeline_mode = #tpu.pipeline_mode<synchronous>, transform_indices = @transform_1, window_bounds = array<i64: 50, 32>}, {pipeline_mode = #tpu.pipeline_mode<synchronous>, transform_indices = @transform_2, window_bounds = array<i64: 32, 32>}, {transform_indices = @transform_3, window_bounds = array<i64: 2, 32>}]} {
    %c0 = arith.constant 0 : index
    %c0_0 = arith.constant 0 : index
    %0 = vector.load %arg1[%c0, %c0_0] : memref<16x1xi32, #tpu.memory_space<vmem>>, vector<16x1xi32>
    %c0_1 = arith.constant 0 : index
    %c0_2 = arith.constant 0 : index
    %1 = vector.load %arg2[%c0_1, %c0_2] : memref<50x32xf32, #tpu.memory_space<vmem>>, vector<50x32xf32>
    %c0_3 = arith.constant 0 : index
    %c0_4 = arith.constant 0 : index
    %2 = vector.load %arg3[%c0_3, %c0_4] : memref<32x32xf32, #tpu.memory_space<vmem>>, vector<32x32xf32>
    %3 = tpu.iota {dimensions = array<i32: 1>} : vector<16x50xi32>
    %4 = vector.broadcast %0 : vector<16x1xi32> to vector<16x50xi32>
    %5 = arith.cmpi eq, %3, %4 : vector<16x50xi32>
    %6 = arith.extui %5 : vector<16x50xi1> to vector<16x50xi32>
    %7 = arith.sitofp %6 : vector<16x50xi32> to vector<16x50xf32>
    %cst = arith.constant dense<0.000000e+00> : vector<16x32xf32>
    %8 = tpu.matmul %7, %1, %cst {dimension_numbers = #tpu.dot_dimension_numbers<[1], [0], [0], [1], [0, 0, 1, 1], [], []>} : vector<16x50xf32>, vector<50x32xf32>, vector<16x32xf32> -> vector<16x32xf32>
    %9 = vector.shape_cast %8 : vector<16x32xf32> to vector<2x8x32xf32>
    %cst_5 = arith.constant dense<0.000000e+00> : vector<2x32xf32>
    %10 = vector.multi_reduction <add>, %9, %cst_5 [1] : vector<2x8x32xf32> to vector<2x32xf32>
    %cst_6 = arith.constant 8.000000e+00 : f32
    %11 = vector.broadcast %cst_6 : f32 to vector<2x32xf32>
    %12 = arith.divf %10, %11 : vector<2x32xf32>
    "tpu.trace_start"() <{level = 10 : i32, message = "be,fe->bf"}> : () -> ()
    %cst_7 = arith.constant dense<0.000000e+00> : vector<2x32xf32>
    %13 = tpu.matmul %12, %2, %cst_7 {dimension_numbers = #tpu.dot_dimension_numbers<[1], [1], [0], [0], [0, 0, 1, 0], [], []>} : vector<2x32xf32>, vector<32x32xf32>, vector<2x32xf32> -> vector<2x32xf32>
    "tpu.trace_stop"() : () -> ()
    %14 = vector.shape_cast %13 : vector<2x32xf32> to vector<2x1x32xf32>
    %15 = vector.broadcast %14 : vector<2x1x32xf32> to vector<2x8x32xf32>
    %16 = arith.mulf %9, %15 : vector<2x8x32xf32>
    %cst_8 = arith.constant dense<0.000000e+00> : vector<2x8xf32>
    %17 = vector.multi_reduction <add>, %16, %cst_8 [2] : vector<2x8x32xf32> to vector<2x8xf32>
    %cst_9 = arith.constant dense<0xFF800000> : vector<2xf32>
    %18 = vector.multi_reduction <maximumf>, %17, %cst_9 [1] : vector<2x8xf32> to vector<2xf32>
    %19 = vector.shape_cast %18 : vector<2xf32> to vector<2x1xf32>
    %20 = vector.broadcast %19 : vector<2x1xf32> to vector<2x8xf32>
    %21 = arith.subf %17, %20 : vector<2x8xf32>
    %22 = math.exp %21 : vector<2x8xf32>
    %cst_10 = arith.constant dense<0.000000e+00> : vector<2xf32>
    %23 = vector.multi_reduction <add>, %22, %cst_10 [1] : vector<2x8xf32> to vector<2xf32>
    %24 = vector.shape_cast %23 : vector<2xf32> to vector<2x1xf32>
    %25 = vector.broadcast %24 : vector<2x1xf32> to vector<2x8xf32>
    %26 = arith.divf %22, %25 : vector<2x8xf32>
    %27 = vector.shape_cast %26 : vector<2x8xf32> to vector<2x8x1xf32>
    %28 = vector.broadcast %27 : vector<2x8x1xf32> to vector<2x8x32xf32>
    %29 = arith.mulf %28, %9 : vector<2x8x32xf32>
    %cst_11 = arith.constant dense<0.000000e+00> : vector<2x32xf32>
    %30 = vector.multi_reduction <add>, %29, %cst_11 [1] : vector<2x8x32xf32> to vector<2x32xf32>
    %c0_12 = arith.constant 0 : index
    %c0_13 = arith.constant 0 : index
    %31 = vector.load %arg4[%c0_12, %c0_13] : memref<2x32xf32, #tpu.memory_space<vmem>>, vector<2x32xf32>
    tpu.vector_store %arg4[%c0_12, %c0_13], %30 {strides = array<i32>} : memref<2x32xf32, #tpu.memory_space<vmem>>, vector<2x32xf32>,
    return
  }
  func.func @transform_0(%arg0: i32) -> (i32, i32) {
    %c0_i32 = arith.constant 0 : i32
    %c0_i32_0 = arith.constant 0 : i32
    return %arg0, %c0_i32 : i32, i32
  }
  func.func @transform_1(%arg0: i32) -> (i32, i32) {
    %c0_i32 = arith.constant 0 : i32
    %c0_i32_0 = arith.constant 0 : i32
    %c0_i32_1 = arith.constant 0 : i32
    return %c0_i32, %c0_i32_0 : i32, i32
  }
  func.func @transform_2(%arg0: i32) -> (i32, i32) {
    %c0_i32 = arith.constant 0 : i32
    %c0_i32_0 = arith.constant 0 : i32
    %c0_i32_1 = arith.constant 0 : i32
    return %c0_i32, %c0_i32_0 : i32, i32
  }
  func.func @transform_3(%arg0: i32) -> (i32, i32) {
    %c0_i32 = arith.constant 0 : i32
    %c0_i32_0 = arith.constant 0 : i32
    return %arg0, %c0_i32 : i32, i32
  }
}

</mosaic_0001>

<bundles_post_ra>
// kernel: tpu_custom_call.1
= control target key start
LH: loop header
LB: loop body
LE: loop exit
PB: predicated region body
PF: predicated region fallthrough
CT: control target
= control target key end

     0   :  { %vm49_vm0 = vcmask 1041408   ;;  %v479_v2 = vmov 0   ;;  %v480_v6 = vmov 0.0   ;;  %s578_s0 = inlined_call_operand.vmem [shape: s32[16,1], index: 0, kind: input, shape index: {}]   ;;  %s579_s1 = inlined_call_operand.vmem [shape: f32[50,32], index: 1, kind: input, shape index: {}]   ;;  %s580_s2 = inlined_call_operand.vmem [shape: f32[32,32], index: 2, kind: input, shape index: {}]   ;;  %s581_s3 = inlined_call_operand.hbm [shape: f32[2,32], index: 3, kind: output, shape index: {}]  }
   0x1   :  { %v15_v0 = vld [vmem:[%s578_s0] sm:$0xff]  ;;  %v23_v1 = vld [vmem:[%s579_s1 + $0x30] sm:$0x3]  ;;  %447 = vset.pattern.permute.xlu0 %v479_v2  ;;  %v22_v3 = vld [vmem:[%s579_s1 + $0x28] sm:$0xff]  ;;  %431 = vmatprep.subr.mxu1 %v480_v6 }
   0x2   :  { %414 = vmatprep.subr.msk.mxu0 %vm49_vm0, %v23_v1  ;;  %31 = vperm.xlu0 %447, %v15_v0   ;;  %v21_v4 = vld [vmem:[%s579_s1 + $0x20] sm:$0xff]  ;;  %v16_v5 = vld [vmem:[%s578_s0 + $0x8] sm:$0xff] }
   0x3   :  { %415 = vmatpush3.msk.msra.mxu0 %vm49_vm0, %v23_v1 }
   0x4   :  { %416 = vmatprep.subr.mxu0 %v22_v3 }
   0x5   :  { %8 = vsyncpa [#allocation3], 0  ;;  %417 = vmatpush3.msra.mxu0 %v22_v3  ;;  %v20_v7 = vld [vmem:[%s579_s1 + $0x18] sm:$0xff]  ;;  %448 = vset.pattern.permute.xlu1 %v479_v2  ;;  %v19_v8 = vld [vmem:[%s579_s1 + $0x10] sm:$0xff]  ;;  %v28_v11 = vlaneseq  ;;  %vm42_vm1 = vcmask 408576   ;;  %vm128_vm4 = vcmask 261120  }
   0x6   :  { %418 = vmatprep.subr.mxu0 %v21_v4  ;;  %34 = vperm.xlu0 %447, %v16_v5   ;;  %v18_v9 = vld [vmem:[%s579_s1 + $0x8] sm:$0xff]  ;;  %v17_v10 = vld [vmem:[%s579_s1] sm:$0xff]  ;;  %v27_v17 = vld [vmem:[%s580_s2 + $0x18] sm:$0xff]  ;;  %vm481_vm5 = vmmov 0   ;;  %vm148_vm6 = vcmask 1041409   ;;  %vm287_vm7 = vcmask 58368  }
   0x7   :  { %419 = vmatpush3.msra.mxu0 %v21_v4  ;;  %v531_v12 = vand.u32 127, %v28_v11  ;;  %432 = vmatpush3.xpose.msk.msra.mxu1 %vm128_vm4, %v27_v17  ;;  %v26_v18 = vld [vmem:[%s580_s2 + $0x10] sm:$0xff]  ;;  %v25_v19 = vld [vmem:[%s580_s2 + $0x8] sm:$0xff]  ;;  %v24_v20 = vld [vmem:[%s580_s2] sm:$0xff]  ;;  %v482_v40 = vmov 1966171168  }
   0x8   :  { %420 = vmatprep.subr.mxu0 %v20_v7  ;;  %433 = vmatprep.subr.mxu1 %v480_v6  ;;  %v236_v41 = vunpack.c.l.s4 %v482_v40  ;;  %v239_v42 = vshrl.u32 %v28_v11, 7  ;;  %s483_s2 = smov [#allocation2]   ;;  %vm374_vm8 = vcmask 254976  }
   0x9   :  { %421 = vmatpush3.msra.mxu0 %v20_v7  ;;  %439 = vmatprep.mubr.msk.f32.mxu1 %vm481_vm5, %v480_v6  ;;  %s382_s9 = sshll.u32 %s483_s2, 4  ;;  %s383_s9 = int_to_ptr.vmem [resolvable:$true] %s382_s9 }
   0xa   :  { %422 = vmatprep.subr.mxu0 %v19_v8  ;;  %v237_v43 = vunpack.c.0.s8 %v236_v41  ;;  %v259_v47 = vsub.s32 0, %v239_v42  ;;  %v279_v59 = vsub.s32 %v531_v12, %v239_v42  ;;  %v298_v1 = vsub.s32 1, %v239_v42  ;;  %s457_s10 = scalar_lea.vmem %s383_s9, 32  ;;  %p462_p1 = scmp.lt.s32.totalorder %s383_s9, %s383_s9 }
   0xb   :  { %423 = vmatpush3.msra.mxu0 %v19_v8  ;;  %434 = vmatpush3.xpose.msk.msra.mxu1 %vm128_vm4, %v26_v18  ;;  %p458_p0 = scmp.ne.s32.totalorder %s383_s9, %s457_s10  ;;  %p463_p2 = scmp.lt.s32.totalorder %s457_s10, %s457_s10 }
   0xc   :  { %424 = vmatprep.subr.mxu0 %v18_v9  ;;  %435 = vmatprep.subr.mxu1 %v480_v6  ;;  %v240_v44 = vsub.s32 %v237_v43, %v239_v42 }
   0xd   :  { %425 = vmatpush3.msra.mxu0 %v18_v9  ;;  %p464_p3 = por %p463_p2, %p462_p1 }
   0xe   :  { %426 = vmatprep.subr.mxu0 %v17_v10 }
   0xf   :  { %427 = vmatpush3.msra.mxu0 %v17_v10  ;;  %436 = vmatpush3.xpose.msk.msra.mxu1 %vm128_vm4, %v25_v19  ;;  %p465_p4 = pnand %p464_p3, %p458_p0 }
  0x10   :  { %437 = vmatprep.subr.mxu1 %v480_v6 }
  0x13   :  { %438 = vmatpush3.xpose.msk.msra.mxu1 %vm128_vm4, %v24_v20 }
  0x7d   :  { %v32_v13 = vpop.permute.xlu0 %31 }
  0x7e   :  { %vm36_vm2 = vcmp.eq.s32.totalorder %v531_v12, %v32_v13 }
  0x7f   :  { %v390_v14 = vsel %vm36_vm2, 1.0, %v480_v6 }
  0x80   :  { %428 = vmatprep.mubr.msk.f32.mxu0 %vm42_vm1, %v390_v14 }
  0x81   :  { %v35_v15 = vpop.permute.xlu0 %34 }
  0x82   :  { %vm37_vm3 = vcmp.eq.s32.totalorder %v531_v12, %v35_v15 }
  0x83   :  { %v391_v16 = vsel %vm37_vm3, 1.0, %v480_v6 }
  0x84   :  { %429 = vmatmul.mubr.msk.f32.vlgmr.msra.gmra.mxu0 %vm42_vm1, %v391_v16 }
 0x144   :  { %v551_v21 = vpop.f32.mrf.mxu0 }
 0x145   :  { %v136_v22 = vsel %vm128_vm4, %v551_v21, 0.0 }
 0x146   :  { %v137_v23 = vrot.slane %v136_v22, 4  ;;  %v555_v24 = vpop.f32.mrf.mxu0 }
 0x147   :  { %v129_v25 = vsel %vm128_vm4, %v555_v24, 0.0 }
 0x148   :  { %v138_v26 = vadd.f32 %v137_v23, %v136_v22  ;;  %v130_v27 = vrot.slane %v129_v25, 4 }
 0x14a   :  { %v139_v28 = vrot.slane %v138_v26, 2  ;;  %v131_v29 = vadd.f32 %v130_v27, %v129_v25 }
 0x14c   :  { %v140_v30 = vadd.f32 %v139_v28, %v138_v26  ;;  %v132_v31 = vrot.slane %v131_v29, 2 }
 0x14e   :  { %v141_v32 = vrot.slane %v140_v30, 1  ;;  %v133_v33 = vadd.f32 %v132_v31, %v131_v29 }
 0x150   :  { %v134_v34 = vrot.slane %v133_v33, 1  ;;  %v142_v35 = vadd.f32 %v141_v32, %v140_v30 }
 0x152   :  { %v135_v36 = vadd.f32 %v134_v34, %v133_v33  ;;  %v145_v38 = vmul.f32 0.125, %v142_v35 }
 0x154   :  { %v144_v37 = vmul.f32 0.125, %v135_v36 }
 0x156   :  { %v149_v39 = vsel %vm148_vm6, %v145_v38, %v144_v37 }
 0x157   :  { %440 = vmatmul.mubr.msk.f32.vlgmr.msra.gmra.mxu1 %vm128_vm4, %v149_v39 }
 0x217   :  { %v230_v45 = vpop.f32.mrf.mxu1 }
 0x218   :  { %v241_v46 = vrot.slane %v230_v45, %v240_v44 }
 0x219   :  { %v441_v48 = vpop.f32.mrf.mxu1 }
 0x21a   :  { %v242_v49 = vcombine.high %v241_v46, %v241_v46  ;;  %v249_v50 = vrot.slane %v241_v46, %v240_v44 }
 0x21c   :  { %v256_v51 = vrot.slane %v242_v49, %v240_v44  ;;  %v260_v52 = vrot.slane %v249_v50, %v259_v47 }
 0x21e   :  { %v267_v53 = vmul.f32 %v260_v52, %v555_v24  ;;  %v264_v54 = vrot.slane %v256_v51, %v259_v47 }
 0x220   :  { %v269_v55 = vsel %vm128_vm4, %v267_v53, 0.0  ;;  %v268_v56 = vmul.f32 %v551_v21, %v264_v54 }
 0x221   :  { %270 = vadd.xlane.f32.xlu1 %v269_v55 }
 0x222   :  { %v272_v57 = vsel %vm128_vm4, %v268_v56, 0.0 }
 0x225   :  { %273 = vadd.xlane.f32.xlu1 %v272_v57 }
 0x2aa   :  { %v271_v58 = vpop.xlane.xlu1 %270 }
 0x2ab   :  { %v280_v61 = vrot.slane %v271_v58, %v279_v59 }
 0x2ae   :  { %v274_v60 = vpop.xlane.xlu1 %273 }
 0x2af   :  { %v284_v62 = vrot.slane %v274_v60, %v279_v59 }
 0x2b1   :  { %v285_v63 = vsel %vm148_vm6, %v284_v62, %v280_v61 }
 0x2b2   :  { %v288_v0 = vsel %vm287_vm7, %v285_v63, -inf }
 0x2b3   :  { %289 = vmax.xlane.f32.xlu0 %v288_v0 }
 0x33c   :  { %v290_v2 = vpop.xlane.xlu0 %289 }
 0x33d   :  { %v295_v3 = vrot.slane %v290_v2, %v259_v47  ;;  %v299_v4 = vrot.slane %v290_v2, %v298_v1 }
 0x33f   :  { %v302_v5 = vsub.f32 %v271_v58, %v295_v3  ;;  %v303_v6 = vsub.f32 %v274_v60, %v299_v4 }
 0x341   :  { %v304_v7 = vmul.f32 1.442695, %v302_v5  ;;  %v306_v8 = vmul.f32 1.442695, %v303_v6 }
 0x343   :  { %449 = vpow2.f32 %v304_v7 }
 0x344   :  { %451 = vpow2.f32 %v306_v8 }
 0x350   :  { %v450_v9 = vpop.eup %449 }
 0x351   :  { %311 = vperm.xlu1 %448, %v450_v9   ;;  %v452_v10 = vpop.eup %451 }
 0x355   :  { %314 = vperm.xlu1 %448, %v452_v10  }
 0x3cc   :  { %v312_v11 = vpop.permute.xlu1 %311 }
 0x3cd   :  { %v319_v13 = vrot.slane %v312_v11, %v279_v59 }
 0x3d0   :  { %v315_v12 = vpop.permute.xlu1 %314 }
 0x3d1   :  { %v323_v14 = vrot.slane %v315_v12, %v279_v59 }
 0x3d3   :  { %v324_v15 = vsel %vm148_vm6, %v323_v14, %v319_v13 }
 0x3d4   :  { %v326_v16 = vsel %vm287_vm7, %v324_v15, 0.0 }
 0x3d5   :  { %327 = vadd.xlane.f32.xlu1 %v326_v16 }
 0x45e   :  { %v328_v17 = vpop.xlane.xlu1 %327 }
 0x45f   :  { %v333_v18 = vrot.slane %v328_v17, %v259_v47  ;;  %v337_v19 = vrot.slane %v328_v17, %v298_v1 }
 0x461   :  { %453 = vrcp.f32 %v333_v18 }
 0x462   :  { %455 = vrcp.f32 %v337_v19 }
 0x46e   :  { %v454_v20 = vpop.eup %453 }
 0x46f   :  { %v341_v22 = vmul.f32 %v454_v20, %v450_v9  ;;  %v456_v23 = vpop.eup %455 }
 0x470   :  { %v343_v25 = vmul.f32 %v456_v23, %v452_v10 }
 0x471   :  { %346 = vperm.xlu0 %447, %v341_v22  }
 0x475   :  { %351 = vperm.xlu0 %447, %v343_v25  }
 0x4ec   :  { %v347_v26 = vpop.permute.xlu0 %346 }
 0x4ed   :  { %v354_v27 = vmul.f32 %v347_v26, %v555_v24 }
 0x4ef   :  { %v356_v28 = vsel %vm128_vm4, %v354_v27, 0.0 }
 0x4f0   :  { %v357_v29 = vrot.slane %v356_v28, 4  ;;  %v352_v30 = vpop.permute.xlu0 %351 }
 0x4f1   :  { %v355_v31 = vmul.f32 %v551_v21, %v352_v30 }
 0x4f2   :  { %v358_v32 = vadd.f32 %v357_v29, %v356_v28 }
 0x4f3   :  { %v363_v33 = vsel %vm128_vm4, %v355_v31, 0.0 }
 0x4f4   :  { %v359_v34 = vrot.slane %v358_v32, 2  ;;  %v364_v35 = vrot.slane %v363_v33, 4 }
 0x4f6   :  { %v360_v36 = vadd.f32 %v359_v34, %v358_v32  ;;  %v365_v37 = vadd.f32 %v364_v35, %v363_v33 }
 0x4f8   :  { %v366_v38 = vrot.slane %v365_v37, 2  ;;  %v361_v39 = vrot.slane %v360_v36, 1 }
 0x4fa   :  { %v367_v40 = vadd.f32 %v366_v38, %v365_v37  ;;  %v362_v24 = vadd.f32 %v361_v39, %v360_v36 }
 0x4fc   :  { %v368_v41 = vrot.slane %v367_v40, 1 }
 0x4fe   :  { %v369_v42 = vadd.f32 %v368_v41, %v367_v40 }
 0x500   :  { %v372_v43 = vsel %vm148_vm6, %v369_v42, %v362_v24 }
 0x501   :  { %375 = vst.msk [vmem:[#allocation2] sm:$0x3] %vm374_vm8, %v372_v43 }
 0x502   :  { %468 = shalt.err (!%p465_p4)
}
 0x503   :  { %385 = dma.vmem_to_hbm [thread:$0]  %s383_s9, 32, %s581_s3, [#allocation3]  }
 0x504   :  { %477 = dma.done.wait [#allocation3], 32  }
 0x505   :  { %478 = vsyncadd [#allocation3], 4294967264 }
 0x506   :  { %389 = vsyncpa [#allocation3], 1 }

</bundles_post_ra>
